<compile_context>
chip_gen: v7x
topology: tpu7x:2x2x1
jax: 0.10.0
libtpu: 0.0.40
codegen_flags: <defaults>
</compile_context>

<pallas_src>
import jax
import jax.numpy as jnp
from jax.experimental import pallas as pl
from jax.experimental.pallas import tpu as pltpu


def gcn_prelude_kernel(aT_ref, sT_ref, w1T_ref, b1T_ref, w2T_ref, b2T_ref, yT_ref):
    """Batch-independent GCN chain, computed once, in transposed form.

    yT = W2^T @ relu(W1^T @ scope^T @ a_hat^T + b1^T) @ a_hat^T + b2^T : (F, S_pad)
    """
    f32 = jnp.float32
    # bf16-resident operands, upcast once; all dots are f32 x f32 -> f32.
    aT = aT_ref[...].astype(f32)      # (S_pad, S_pad) = a_hat^T (zero padded)
    sT = sT_ref[...].astype(f32)      # (F, S_pad)     = scope_emb^T
    w1T = w1T_ref[...].astype(f32)    # (H, F)
    w2T = w2T_ref[...].astype(f32)    # (F, H)

    # GCN layer 1 (transposed): hT = relu(W1^T @ scope^T @ a_hat^T + b1^T) : (H, S_pad)
    t1 = jnp.dot(w1T, sT, preferred_element_type=f32)            # (H, S_pad)
    hT = jnp.dot(t1, aT, preferred_element_type=f32)             # (H, S_pad)
    hT = jnp.maximum(hT + b1T_ref[...], 0.0)                     # relu; dropout(0.0) elided

    # GCN layer 2 (transposed): yT = W2^T @ hT @ a_hat^T + b2^T : (F, S_pad)
    t2 = jnp.dot(w2T, hT, preferred_element_type=f32)            # (F, S_pad)
    yT_ref[...] = jnp.dot(t2, aT, preferred_element_type=f32) + b2T_ref[...]


def readout_kernel(x_ref, yT_ref, o_ref):
    """Per-batch-tile readout: z = x @ y^T as lane-dense (TB, F) @ (F, S_pad)."""
    x = x_ref[...].astype(jnp.float32)
    o_ref[...] = jnp.dot(x, yT_ref[...], preferred_element_type=jnp.float32)


@jax.jit
def el_gcn_forward(x, a_hat, scope_emb, w1, b1, w2, b2):
    B, F = x.shape
    S = scope_emb.shape[0]
    H = w1.shape[1]

    # Lane-dense scope axis, sublane-dense batch axis.
    S_pad = ((S + 127) // 128) * 128
    B_pad = ((B + 7) // 8) * 8
    if B_pad >= 256:        # v6e/v7x MXU passes are 256 wide; keep TB=128 on v5e.
        TB = 256
        B_pad = ((B_pad + 255) // 256) * 256
    elif B_pad >= 128:
        TB = 128
        B_pad = ((B_pad + 127) // 128) * 128
    else:
        TB = B_pad

    bf16 = jnp.bfloat16
    # Wrapper-side padding + transposes + bf16 casts (layout/DMA plumbing only).
    x_p = jnp.zeros((B_pad, F), bf16).at[:B, :].set(x.astype(bf16))
    aT = jnp.zeros((S_pad, S_pad), bf16).at[:S, :S].set(a_hat.T.astype(bf16))
    sT = jnp.zeros((F, S_pad), bf16).at[:, :S].set(scope_emb.T.astype(bf16))
    w1T = w1.T.astype(bf16)                                   # (H, F)
    w2T = w2.T.astype(bf16)                                   # (F, H)
    b1T = jnp.reshape(b1.astype(jnp.float32), (H, 1))         # (H, 1), f32
    b2T = jnp.reshape(b2.astype(jnp.float32), (F, 1))         # (F, 1), f32

    # ---- Stage 1: batch-independent GCN prelude, computed exactly once. ----
    yT = pl.pallas_call(
        gcn_prelude_kernel,
        out_shape=jax.ShapeDtypeStruct((F, S_pad), jnp.float32),
        grid=(1,),
        in_specs=[
            pl.BlockSpec((S_pad, S_pad), lambda i: (0, 0)),   # a_hat^T (resident)
            pl.BlockSpec((F, S_pad), lambda i: (0, 0)),       # scope_emb^T
            pl.BlockSpec((H, F), lambda i: (0, 0)),           # W1^T
            pl.BlockSpec((H, 1), lambda i: (0, 0)),           # b1^T
            pl.BlockSpec((F, H), lambda i: (0, 0)),           # W2^T
            pl.BlockSpec((F, 1), lambda i: (0, 0)),           # b2^T
        ],
        out_specs=pl.BlockSpec((F, S_pad), lambda i: (0, 0)),
        compiler_params=pltpu.CompilerParams(
            dimension_semantics=("arbitrary",),
            vmem_limit_bytes=64 * 1024 * 1024,
        ),
    )(aT, sT, w1T, b1T, w2T, b2T)

    # ---- Stage 2: batch-parallel readout, z = x @ y^T (lane-dense output). ----
    z_pad = pl.pallas_call(
        readout_kernel,
        out_shape=jax.ShapeDtypeStruct((B_pad, S_pad), jnp.float32),
        grid=(B_pad // TB,),
        in_specs=[
            pl.BlockSpec((TB, F), lambda i: (i, 0)),          # x tile (per grid step)
            pl.BlockSpec((F, S_pad), lambda i: (0, 0),        # yT: grid-invariant,
                         pipeline_mode=pl.Buffered(1)),       #   single-buffered
        ],
        out_specs=pl.BlockSpec((TB, S_pad), lambda i: (i, 0)),
        compiler_params=pltpu.CompilerParams(
            dimension_semantics=("parallel",),
            vmem_limit_bytes=64 * 1024 * 1024,
        ),
    )(x_p, yT)

    return z_pad[:B, :S]


def el_gcn_reference(x, a_hat, scope_emb, w1, b1, w2, b2):
    h = jnp.maximum(a_hat @ (scope_emb @ w1) + b1, 0.0)
    y = a_hat @ (h @ w2) + b2
    return x @ y.T


if __name__ == "__main__":
    # Small shapes consistent with the module.
    B = 2      # batch
    F = 32     # in_features_dim
    H = 16     # hidden_dim
    S = 8      # len_scope
    OUT = 24   # out_features_dim (only used by the unused nn.Linear)

    key = jax.random.PRNGKey(0)
    keys = jax.random.split(key, 8)

    x = jax.random.normal(keys[0], (B, F), dtype=jnp.float32)
    # Normalized adjacency of the scope graph (S x S), deterministic.
    a_raw = jax.random.uniform(keys[1], (S, S), dtype=jnp.float32)
    a_sym = 0.5 * (a_raw + a_raw.T) + jnp.eye(S, dtype=jnp.float32)
    a_hat = a_sym / jnp.sum(a_sym, axis=1, keepdims=True)

    scope_emb = jax.random.normal(keys[2], (S, F), dtype=jnp.float32)

    # GraphConvolution parameters (in->hidden, hidden->in).
    w1 = jax.random.normal(keys[3], (F, H), dtype=jnp.float32) * 0.1
    b1 = jax.random.normal(keys[4], (1, H), dtype=jnp.float32) * 0.1
    w2 = jax.random.normal(keys[5], (H, F), dtype=jnp.float32) * 0.1
    b2 = jax.random.normal(keys[6], (1, F), dtype=jnp.float32) * 0.1

    # Unused-in-forward nn.Linear(in_features_dim, out_features_dim): params only.
    lin_w = jax.random.normal(keys[7], (OUT, F), dtype=jnp.float32) * 0.1
    lin_b = jnp.zeros((OUT,), dtype=jnp.float32)
    # TODO(synk): self.linear is never invoked in EL_GCN.forward; no compute emitted.

    z = jax.block_until_ready(el_gcn_forward(x, a_hat, scope_emb, w1, b1, w2, b2))
    z_ref = el_gcn_reference(x, a_hat, scope_emb, w1, b1, w2, b2)

    assert z.shape == (B, S), z.shape
    max_err = float(jnp.max(jnp.abs(z - z_ref)))
    # Inputs rounded to bf16 (DMA/VMEM saving); accumulation in f32 -> relaxed tol.
    assert jnp.allclose(z, z_ref, atol=3e-2, rtol=3e-2), max_err
    print("KERNEL_OK")
</pallas_src>

<mosaic_0001>
module attributes {stable_mosaic.version = 11 : i64} {
  func.func @gcn_prelude_kernel(%arg0: i32, %arg1: memref<128x128xbf16, #tpu.memory_space<vmem>>, %arg2: memref<32x128xbf16, #tpu.memory_space<vmem>>, %arg3: memref<16x32xbf16, #tpu.memory_space<vmem>>, %arg4: memref<16x1xf32, #tpu.memory_space<vmem>>, %arg5: memref<32x16xbf16, #tpu.memory_space<vmem>>, %arg6: memref<32x1xf32, #tpu.memory_space<vmem>>, %arg7: memref<32x128xf32, #tpu.memory_space<vmem>>) attributes {dimension_semantics = [#tpu.dimension_semantics<arbitrary>], iteration_bounds = array<i64: 1>, scalar_prefetch = 0 : i64, scratch_operands = 0 : i64, tpu.core_type = #tpu.core_type<tc>, window_params = [{pipeline_mode = #tpu.pipeline_mode<synchronous>, transform_indices = @transform_0, window_bounds = array<i64: 128, 128>}, {pipeline_mode = #tpu.pipeline_mode<synchronous>, transform_indices = @transform_1, window_bounds = array<i64: 32, 128>}, {pipeline_mode = #tpu.pipeline_mode<synchronous>, transform_indices = @transform_2, window_bounds = array<i64: 16, 32>}, {pipeline_mode = #tpu.pipeline_mode<synchronous>, transform_indices = @transform_3, window_bounds = array<i64: 16, 1>}, {pipeline_mode = #tpu.pipeline_mode<synchronous>, transform_indices = @transform_4, window_bounds = array<i64: 32, 16>}, {pipeline_mode = #tpu.pipeline_mode<synchronous>, transform_indices = @transform_5, window_bounds = array<i64: 32, 1>}, {pipeline_mode = #tpu.pipeline_mode<synchronous>, transform_indices = @transform_6, window_bounds = array<i64: 32, 128>}]} {
    %c0 = arith.constant 0 : index
    %c0_0 = arith.constant 0 : index
    %0 = vector.load %arg1[%c0, %c0_0] : memref<128x128xbf16, #tpu.memory_space<vmem>>, vector<128x128xbf16>
    %1 = arith.extf %0 : vector<128x128xbf16> to vector<128x128xf32>
    %c0_1 = arith.constant 0 : index
    %c0_2 = arith.constant 0 : index
    %2 = vector.load %arg2[%c0_1, %c0_2] : memref<32x128xbf16, #tpu.memory_space<vmem>>, vector<32x128xbf16>
    %3 = arith.extf %2 : vector<32x128xbf16> to vector<32x128xf32>
    %c0_3 = arith.constant 0 : index
    %c0_4 = arith.constant 0 : index
    %4 = vector.load %arg3[%c0_3, %c0_4] : memref<16x32xbf16, #tpu.memory_space<vmem>>, vector<16x32xbf16>
    %5 = arith.extf %4 : vector<16x32xbf16> to vector<16x32xf32>
    %c0_5 = arith.constant 0 : index
    %c0_6 = arith.constant 0 : index
    %6 = vector.load %arg5[%c0_5, %c0_6] : memref<32x16xbf16, #tpu.memory_space<vmem>>, vector<32x16xbf16>
    %7 = arith.extf %6 : vector<32x16xbf16> to vector<32x16xf32>
    %cst = arith.constant dense<0.000000e+00> : vector<16x128xf32>
    %8 = tpu.matmul %5, %3, %cst {dimension_numbers = #tpu.dot_dimension_numbers<[1], [0], [0], [1], [0, 0, 1, 1], [], []>} : vector<16x32xf32>, vector<32x128xf32>, vector<16x128xf32> -> vector<16x128xf32>
    %cst_7 = arith.constant dense<0.000000e+00> : vector<16x128xf32>
    %9 = tpu.matmul %8, %1, %cst_7 {dimension_numbers = #tpu.dot_dimension_numbers<[1], [0], [0], [1], [0, 0, 1, 1], [], []>} : vector<16x128xf32>, vector<128x128xf32>, vector<16x128xf32> -> vector<16x128xf32>
    %c0_8 = arith.constant 0 : index
    %c0_9 = arith.constant 0 : index
    %10 = vector.load %arg4[%c0_8, %c0_9] : memref<16x1xf32, #tpu.memory_space<vmem>>, vector<16x1xf32>
    %11 = vector.broadcast %10 : vector<16x1xf32> to vector<16x128xf32>
    %12 = arith.addf %9, %11 : vector<16x128xf32>
    %cst_10 = arith.constant 0.000000e+00 : f32
    %13 = vector.broadcast %cst_10 : f32 to vector<16x128xf32>
    %14 = arith.maximumf %12, %13 : vector<16x128xf32>
    %cst_11 = arith.constant dense<0.000000e+00> : vector<32x128xf32>
    %15 = tpu.matmul %7, %14, %cst_11 {dimension_numbers = #tpu.dot_dimension_numbers<[1], [0], [0], [1], [0, 0, 1, 1], [], []>} : vector<32x16xf32>, vector<16x128xf32>, vector<32x128xf32> -> vector<32x128xf32>
    %cst_12 = arith.constant dense<0.000000e+00> : vector<32x128xf32>
    %16 = tpu.matmul %15, %1, %cst_12 {dimension_numbers = #tpu.dot_dimension_numbers<[1], [0], [0], [1], [0, 0, 1, 1], [], []>} : vector<32x128xf32>, vector<128x128xf32>, vector<32x128xf32> -> vector<32x128xf32>
    %c0_13 = arith.constant 0 : index
    %c0_14 = arith.constant 0 : index
    %17 = vector.load %arg6[%c0_13, %c0_14] : memref<32x1xf32, #tpu.memory_space<vmem>>, vector<32x1xf32>
    %18 = vector.broadcast %17 : vector<32x1xf32> to vector<32x128xf32>
    %19 = arith.addf %16, %18 : vector<32x128xf32>
    %c0_15 = arith.constant 0 : index
    %c0_16 = arith.constant 0 : index
    %20 = vector.load %arg7[%c0_15, %c0_16] : memref<32x128xf32, #tpu.memory_space<vmem>>, vector<32x128xf32>
    tpu.vector_store %arg7[%c0_15, %c0_16], %19 {strides = array<i32>} : memref<32x128xf32, #tpu.memory_space<vmem>>, vector<32x128xf32>,
    return
  }
  func.func @transform_0(%arg0: i32) -> (i32, i32) {
    %c0_i32 = arith.constant 0 : i32
    %c0_i32_0 = arith.constant 0 : i32
    %c0_i32_1 = arith.constant 0 : i32
    return %c0_i32, %c0_i32_0 : i32, i32
  }
  func.func @transform_1(%arg0: i32) -> (i32, i32) {
    %c0_i32 = arith.constant 0 : i32
    %c0_i32_0 = arith.constant 0 : i32
    %c0_i32_1 = arith.constant 0 : i32
    return %c0_i32, %c0_i32_0 : i32, i32
  }
  func.func @transform_2(%arg0: i32) -> (i32, i32) {
    %c0_i32 = arith.constant 0 : i32
    %c0_i32_0 = arith.constant 0 : i32
    %c0_i32_1 = arith.constant 0 : i32
    return %c0_i32, %c0_i32_0 : i32, i32
  }
  func.func @transform_3(%arg0: i32) -> (i32, i32) {
    %c0_i32 = arith.constant 0 : i32
    %c0_i32_0 = arith.constant 0 : i32
    %c0_i32_1 = arith.constant 0 : i32
    return %c0_i32, %c0_i32_0 : i32, i32
  }
  func.func @transform_4(%arg0: i32) -> (i32, i32) {
    %c0_i32 = arith.constant 0 : i32
    %c0_i32_0 = arith.constant 0 : i32
    %c0_i32_1 = arith.constant 0 : i32
    return %c0_i32, %c0_i32_0 : i32, i32
  }
  func.func @transform_5(%arg0: i32) -> (i32, i32) {
    %c0_i32 = arith.constant 0 : i32
    %c0_i32_0 = arith.constant 0 : i32
    %c0_i32_1 = arith.constant 0 : i32
    return %c0_i32, %c0_i32_0 : i32, i32
  }
  func.func @transform_6(%arg0: i32) -> (i32, i32) {
    %c0_i32 = arith.constant 0 : i32
    %c0_i32_0 = arith.constant 0 : i32
    %c0_i32_1 = arith.constant 0 : i32
    return %c0_i32, %c0_i32_0 : i32, i32
  }
}

module attributes {stable_mosaic.version = 11 : i64} {
  func.func @readout_kernel(%arg0: i32, %arg1: memref<8x32xbf16, #tpu.memory_space<vmem>>, %arg2: memref<32x128xf32, #tpu.memory_space<vmem>>, %arg3: memref<8x128xf32, #tpu.memory_space<vmem>>) attributes {dimension_semantics = [#tpu.dimension_semantics<parallel>], iteration_bounds = array<i64: 1>, scalar_prefetch = 0 : i64, scratch_operands = 0 : i64, tpu.core_type = #tpu.core_type<tc>, window_params = [{transform_indices = @transform_0, window_bounds = array<i64: 8, 32>}, {pipeline_mode = #tpu.pipeline_mode<synchronous>, transform_indices = @transform_1, window_bounds = array<i64: 32, 128>}, {transform_indices = @transform_2, window_bounds = array<i64: 8, 128>}]} {
    %c0 = arith.constant 0 : index
    %c0_0 = arith.constant 0 : index
    %0 = vector.load %arg1[%c0, %c0_0] : memref<8x32xbf16, #tpu.memory_space<vmem>>, vector<8x32xbf16>
    %1 = arith.extf %0 : vector<8x32xbf16> to vector<8x32xf32>
    %c0_1 = arith.constant 0 : index
    %c0_2 = arith.constant 0 : index
    %2 = vector.load %arg2[%c0_1, %c0_2] : memref<32x128xf32, #tpu.memory_space<vmem>>, vector<32x128xf32>
    %cst = arith.constant dense<0.000000e+00> : vector<8x128xf32>
    %3 = tpu.matmul %1, %2, %cst {dimension_numbers = #tpu.dot_dimension_numbers<[1], [0], [0], [1], [0, 0, 1, 1], [], []>} : vector<8x32xf32>, vector<32x128xf32>, vector<8x128xf32> -> vector<8x128xf32>
    %c0_3 = arith.constant 0 : index
    %c0_4 = arith.constant 0 : index
    %4 = vector.load %arg3[%c0_3, %c0_4] : memref<8x128xf32, #tpu.memory_space<vmem>>, vector<8x128xf32>
    tpu.vector_store %arg3[%c0_3, %c0_4], %3 {strides = array<i32>} : memref<8x128xf32, #tpu.memory_space<vmem>>, vector<8x128xf32>,
    return
  }
  func.func @transform_0(%arg0: i32) -> (i32, i32) {
    %c0_i32 = arith.constant 0 : i32
    %c0_i32_0 = arith.constant 0 : i32
    return %arg0, %c0_i32 : i32, i32
  }
  func.func @transform_1(%arg0: i32) -> (i32, i32) {
    %c0_i32 = arith.constant 0 : i32
    %c0_i32_0 = arith.constant 0 : i32
    %c0_i32_1 = arith.constant 0 : i32
    return %c0_i32, %c0_i32_0 : i32, i32
  }
  func.func @transform_2(%arg0: i32) -> (i32, i32) {
    %c0_i32 = arith.constant 0 : i32
    %c0_i32_0 = arith.constant 0 : i32
    return %arg0, %c0_i32 : i32, i32
  }
}

</mosaic_0001>

<bundles_post_ra>
// kernel: el_gcn_forward.3
= control target key start
LH: loop header
LB: loop body
LE: loop exit
PB: predicated region body
PF: predicated region fallthrough
CT: control target
= control target key end

     0   :  { %7 = vsyncpa [#allocation3], 0  ;;  %s304_s0 = inlined_call_operand.hbm [shape: bf16[8,32], index: 0, kind: input, shape index: {}]   ;;  %s305_s1 = inlined_call_operand.hbm [shape: f32[32,128], index: 1, kind: input, shape index: {}]   ;;  %s306_s2 = inlined_call_operand.hbm [shape: f32[8,128], index: 2, kind: output, shape index: {}]  }
   0x1   :  { %8 = vsyncpa [#allocation6], 0 }
   0x2   :  { %9 = vsyncpa [#allocation4], 0  ;;  %s238_s9 = smov [#allocation2]   ;;  %s239_s11 = smov [#allocation5]  }
   0x3   :  { %s16_s10 = sshll.u32 %s238_s9, 4  ;;  %s25_s12 = sshll.u32 %s239_s11, 4  ;;  %s17_s10 = int_to_ptr.vmem [resolvable:$true] %s16_s10  ;;  %s261_s12 = int_to_ptr.vmem [resolvable:$true] %s25_s12 }
   0x4   :  { %s166_s15 = scalar_lea.hbm %s304_s0, 64 }
   0x5   :  { %p167_p0 = scmp.ne.s32.totalorder %s304_s0, %s166_s15  ;;  %p170_p1 = scmp.lt.u32.totalorder %s166_s15, %s304_s0 }
   0x7   :  { %p172_p2 = pnand %p170_p1, %p167_p0 }
   0x9   :  { %175 = shalt.err (!%p172_p2)
}
   0xa   :  { %s176_s20 = scalar_lea.vmem %s17_s10, 64  ;;  %p181_p4 = scmp.lt.s32.totalorder %s17_s10, %s17_s10 }
   0xb   :  { %p177_p3 = scmp.ne.s32.totalorder %s17_s10, %s176_s20  ;;  %p182_p5 = scmp.lt.s32.totalorder %s176_s20, %s176_s20 }
   0xd   :  { %p183_p6 = por %p182_p5, %p181_p4 }
   0xf   :  { %p184_p7 = pnand %p183_p6, %p177_p3 }
  0x11   :  { %187 = shalt.err (!%p184_p7)
}
  0x12   :  { %19 = dma.hbm_to_vmem [thread:$0]  %s304_s0, 64, %s17_s10, [#allocation3]  }
  0x13   :  { %s188_s25 = scalar_lea.hbm %s305_s1, 512 }
  0x14   :  { %p189_p8 = scmp.ne.s32.totalorder %s305_s1, %s188_s25  ;;  %p192_p9 = scmp.lt.u32.totalorder %s188_s25, %s305_s1 }
  0x16   :  { %p194_p10 = pnand %p192_p9, %p189_p8 }
  0x18   :  { %197 = shalt.err (!%p194_p10)
}
  0x19   :  { %s198_s30 = scalar_lea.vmem %s261_s12, 512  ;;  %p203_p12 = scmp.lt.s32.totalorder %s261_s12, %s261_s12 }
  0x1a   :  { %p199_p11 = scmp.ne.s32.totalorder %s261_s12, %s198_s30  ;;  %p204_p13 = scmp.lt.s32.totalorder %s198_s30, %s198_s30 }
  0x1c   :  { %p205_p0 = por %p204_p13, %p203_p12 }
  0x1e   :  { %p206_p1 = pnand %p205_p0, %p199_p11 }
  0x20   :  { %209 = shalt.err (!%p206_p1)
}
  0x21   :  { %s240_s0 = smov 128   ;;  %s241_s3 = smov 8  }
  0x22   :  { %31 = dma.hbm_to_vmem [thread:$0]  %s305_s1, 512, %s261_s12, [#allocation6], %s240_s0, %s240_s0, %s241_s3  }
  0x23   :  { %232 = dma.done.wait [#allocation3], 64  }
  0x24   :  { %233 = vsyncadd [#allocation3], 4294967232 }
  0x25   :  { %234 = dma.done.wait [#allocation6], 512  }
  0x26   :  { %235 = vsyncadd [#allocation6], 4294966784  ;;  %v242_v0 = vmov 0.0|0.0   ;;  %vm243_vm0 = vmmov 0   ;;  %v244_v1 = vmov 0.0   ;;  %v40_v2 = vld [vmem:[#allocation5] sm:$0xff] }
  0x27   :  { %152 = vmatprep.subr.bf16.mxu0 %v242_v0  ;;  %149 = vmatprep.mubr.msk.f32.mxu0 %vm243_vm0, %v244_v1  ;;  %v41_v3 = vld [vmem:[#allocation5 + $0x8] sm:$0xff]  ;;  %v42_v4 = vld [vmem:[#allocation5 + $0x10] sm:$0xff]  ;;  %v43_v6 = vld [vmem:[#allocation5 + $0x18] sm:$0xff]  ;;  %vm44_vm1 = vcmask 261120   ;;  %s245_s1 = smov [#allocation7]  }
  0x28   :  { %v153_v5 = vpack.c.bf16 %v41_v3, %v40_v2  ;;  %v156_v7 = vpack.c.bf16 %v43_v6, %v42_v4  ;;  %v38_v8 = vld [vmem:[#allocation2] sm:$0xf]  ;;  %s125_s6 = sshll.u32 %s245_s1, 4  ;;  %s126_s6 = int_to_ptr.vmem [resolvable:$true] %s125_s6 }
  0x29   :  { %v39_v9 = vunpack.c.l.bf16 %v38_v8  ;;  %s210_s7 = scalar_lea.vmem %s126_s6, 128  ;;  %p215_p3 = scmp.lt.s32.totalorder %s126_s6, %s126_s6 }
  0x2a   :  { %154 = vmatpush3.bf16.msra.mxu0 %v153_v5  ;;  %p211_p2 = scmp.ne.s32.totalorder %s126_s6, %s210_s7  ;;  %p216_p4 = scmp.lt.s32.totalorder %s210_s7, %s210_s7 }
  0x2b   :  { %155 = vmatprep.subr.bf16.mxu0 %v242_v0 }
  0x2c   :  { %p217_p5 = por %p216_p4, %p215_p3 }
  0x2e   :  { %157 = vmatpush3.bf16.msra.mxu0 %v156_v7  ;;  %p218_p6 = pnand %p217_p5, %p211_p2 }
  0x31   :  { %150 = vmatmul.mubr.msk.f32.vlgmr.msra.gmra.mrb[0].mxu0 %vm44_vm1, %v39_v9 }
 0x104   :  { %v114_v10 = vpop.f32.mrb[0].mxu0 }
 0x105   :  { %118 = vst [vmem:[#allocation7] sm:$0xff] %v114_v10  ;;  %v151_v11 = vpop.f32.mrb[1].mxu0 }
 0x106   :  { %221 = shalt.err (!%p218_p6)
}
 0x107   :  { %s222_s10 = scalar_lea.hbm %s306_s2, 128 }
 0x108   :  { %p223_p7 = scmp.ne.s32.totalorder %s306_s2, %s222_s10  ;;  %p226_p8 = scmp.lt.u32.totalorder %s222_s10, %s306_s2 }
 0x10a   :  { %p228_p9 = pnand %p226_p8, %p223_p7 }
 0x10c   :  { %231 = shalt.err (!%p228_p9)
}
 0x10d   :  { %128 = dma.vmem_to_hbm [thread:$0]  %s126_s6, 128, %s306_s2, [#allocation4]  }
 0x10e   :  { %236 = dma.done.wait [#allocation4], 128  }
 0x10f   :  { %237 = vsyncadd [#allocation4], 4294967168 }
 0x110   :  { %132 = vsyncpa [#allocation3], 1 }
 0x111   :  { %133 = vsyncpa [#allocation6], 1 }
 0x112   :  { %134 = vsyncpa [#allocation4], 1 }

// kernel: el_gcn_forward.2
= control target key start
LH: loop header
LB: loop body
LE: loop exit
PB: predicated region body
PF: predicated region fallthrough
CT: control target
= control target key end

     0   :  { %11 = vsyncpa [#allocation3], 0  ;;  %s1202_s0 = inlined_call_operand.hbm [shape: bf16[128,128], index: 0, kind: input, shape index: {}]   ;;  %s1203_s1 = inlined_call_operand.hbm [shape: bf16[32,128], index: 1, kind: input, shape index: {}]   ;;  %s1204_s2 = inlined_call_operand.hbm [shape: bf16[16,32], index: 2, kind: input, shape index: {}]   ;;  %s1205_s3 = inlined_call_operand.hbm [shape: f32[16,1], index: 3, kind: input, shape index: {}]   ;;  %s1206_s4 = inlined_call_operand.hbm [shape: bf16[32,16], index: 4, kind: input, shape index: {}]   ;;  %s1207_s5 = inlined_call_operand.hbm [shape: f32[32,1], index: 5, kind: input, shape index: {}]   ;;  %s1208_s6 = inlined_call_operand.hbm [shape: f32[32,128], index: 6, kind: output, shape index: {}]  }
   0x1   :  { %12 = vsyncpa [#allocation6], 0 }
   0x2   :  { %13 = vsyncpa [#allocation9], 0 }
   0x3   :  { %14 = vsyncpa [#allocation12], 0 }
   0x4   :  { %15 = vsyncpa [#allocation4], 0  ;;  %s1025_s21 = smov [#allocation5]   ;;  %s1026_s23 = smov [#allocation8]  }
   0x5   :  { %s33_s22 = sshll.u32 %s1025_s21, 4  ;;  %s57_s24 = sshll.u32 %s1026_s23, 4  ;;  %s34_s22 = int_to_ptr.vmem [resolvable:$true] %s33_s22  ;;  %s1072_s24 = int_to_ptr.vmem [resolvable:$true] %s57_s24 }
   0x6   :  { %s861_s27 = scalar_lea.hbm %s1203_s1, 256 }
   0x7   :  { %p862_p0 = scmp.ne.s32.totalorder %s1203_s1, %s861_s27  ;;  %p865_p1 = scmp.lt.u32.totalorder %s861_s27, %s1203_s1 }
   0x9   :  { %p867_p2 = pnand %p865_p1, %p862_p0 }
   0xb   :  { %870 = shalt.err (!%p867_p2)
}
   0xc   :  { %s871_s8 = scalar_lea.vmem %s34_s22, 256  ;;  %p876_p4 = scmp.lt.s32.totalorder %s34_s22, %s34_s22 }
   0xd   :  { %p872_p3 = scmp.ne.s32.totalorder %s34_s22, %s871_s8  ;;  %p877_p5 = scmp.lt.s32.totalorder %s871_s8, %s871_s8 }
   0xf   :  { %p878_p6 = por %p877_p5, %p876_p4 }
  0x11   :  { %p879_p7 = pnand %p878_p6, %p872_p3 }
  0x13   :  { %882 = shalt.err (!%p879_p7)
}
  0x14   :  { %s1027_s9 = smov 64   ;;  %s1028_s10 = smov 4  }
  0x15   :  { %39 = dma.hbm_to_vmem [thread:$0]  %s1203_s1, 256, %s34_s22, [#allocation6], %s1027_s9, %s1027_s9, %s1028_s10  }
  0x16   :  { %s883_s15 = scalar_lea.hbm %s1205_s3, 256 }
  0x17   :  { %p884_p8 = scmp.ne.s32.totalorder %s1205_s3, %s883_s15  ;;  %p887_p9 = scmp.lt.u32.totalorder %s883_s15, %s1205_s3 }
  0x19   :  { %p889_p10 = pnand %p887_p9, %p884_p8 }
  0x1b   :  { %892 = shalt.err (!%p889_p10)
}
  0x1c   :  { %s893_s20 = scalar_lea.vmem %s1072_s24, 256  ;;  %p898_p12 = scmp.lt.s32.totalorder %s1072_s24, %s1072_s24 }
  0x1d   :  { %p894_p11 = scmp.ne.s32.totalorder %s1072_s24, %s893_s20  ;;  %p899_p13 = scmp.lt.s32.totalorder %s893_s20, %s893_s20 }
  0x1f   :  { %p900_p0 = por %p899_p13, %p898_p12 }
  0x21   :  { %p901_p1 = pnand %p900_p0, %p894_p11 }
  0x23   :  { %904 = shalt.err (!%p901_p1)
}
  0x24   :  { %s1029_s1 = smov 128   ;;  %s1030_s21 = smov 8  }
  0x25   :  { %63 = dma.hbm_to_vmem [thread:$0]  %s1205_s3, 256, %s1072_s24, [#allocation9], %s1029_s1, %s1029_s1, %s1030_s21  }
  0x26   :  { %s1031_s25 = smov [#allocation2]   ;;  %s1032_s27 = smov [#allocation7]  }
  0x27   :  { %s21_s26 = sshll.u32 %s1031_s25, 4  ;;  %s45_s28 = sshll.u32 %s1032_s27, 4  ;;  %s22_s26 = int_to_ptr.vmem [resolvable:$true] %s21_s26  ;;  %s1109_s28 = int_to_ptr.vmem [resolvable:$true] %s45_s28 }
  0x28   :  { %s905_s7 = scalar_lea.hbm %s1202_s0, 1024 }
  0x29   :  { %p906_p2 = scmp.ne.s32.totalorder %s1202_s0, %s905_s7  ;;  %p909_p3 = scmp.lt.u32.totalorder %s905_s7, %s1202_s0 }
  0x2b   :  { %p911_p4 = pnand %p909_p3, %p906_p2 }
  0x2d   :  { %914 = shalt.err (!%p911_p4)
}
  0x2e   :  { %s915_s3 = scalar_lea.vmem %s22_s26, 1024  ;;  %p920_p6 = scmp.lt.s32.totalorder %s22_s26, %s22_s26 }
  0x2f   :  { %p916_p5 = scmp.ne.s32.totalorder %s22_s26, %s915_s3  ;;  %p921_p7 = scmp.lt.s32.totalorder %s915_s3, %s915_s3 }
  0x31   :  { %p922_p8 = por %p921_p7, %p920_p6 }
  0x33   :  { %p923_p9 = pnand %p922_p8, %p916_p5 }
  0x35   :  { %926 = shalt.err (!%p923_p9)
}
  0x36   :  { %27 = dma.hbm_to_vmem [thread:$0]  %s1202_s0, 1024, %s22_s26, [#allocation3], %s1027_s9, %s1027_s9, %s1028_s10  }
  0x37   :  { %s927_s17 = scalar_lea.hbm %s1204_s2, 128 }
  0x38   :  { %p928_p10 = scmp.ne.s32.totalorder %s1204_s2, %s927_s17  ;;  %p931_p11 = scmp.lt.u32.totalorder %s927_s17, %s1204_s2 }
  0x3a   :  { %p933_p12 = pnand %p931_p11, %p928_p10 }
  0x3c   :  { %936 = shalt.err (!%p933_p12)
}
  0x3d   :  { %s937_s23 = scalar_lea.vmem %s1109_s28, 128  ;;  %p942_p0 = scmp.lt.s32.totalorder %s1109_s28, %s1109_s28 }
  0x3e   :  { %p938_p13 = scmp.ne.s32.totalorder %s1109_s28, %s937_s23  ;;  %p943_p1 = scmp.lt.s32.totalorder %s937_s23, %s937_s23 }
  0x40   :  { %p944_p2 = por %p943_p1, %p942_p0 }
  0x42   :  { %p945_p3 = pnand %p944_p2, %p938_p13 }
  0x44   :  { %948 = shalt.err (!%p945_p3)
}
  0x45   :  { %51 = dma.hbm_to_vmem [thread:$0]  %s1204_s2, 128, %s1109_s28, [#allocation6], %s1027_s9, %s1027_s9, %s1028_s10  }
  0x46   :  { %s1033_s26 = smov [#allocation10]   ;;  %s1034_s29 = smov [#allocation11]  }
  0x47   :  { %s69_s27 = sshll.u32 %s1033_s26, 4  ;;  %s81_s30 = sshll.u32 %s1034_s29, 4  ;;  %s70_s27 = int_to_ptr.vmem [resolvable:$true] %s69_s27  ;;  %s1146_s30 = int_to_ptr.vmem [resolvable:$true] %s81_s30 }
  0x48   :  { %s949_s11 = scalar_lea.hbm %s1206_s4, 256 }
  0x49   :  { %p950_p4 = scmp.ne.s32.totalorder %s1206_s4, %s949_s11  ;;  %p953_p5 = scmp.lt.u32.totalorder %s949_s11, %s1206_s4 }
  0x4b   :  { %p955_p6 = pnand %p953_p5, %p950_p4 }
  0x4d   :  { %958 = shalt.err (!%p955_p6)
}
  0x4e   :  { %s959_s2 = scalar_lea.vmem %s70_s27, 256  ;;  %p964_p8 = scmp.lt.s32.totalorder %s70_s27, %s70_s27 }
  0x4f   :  { %p960_p7 = scmp.ne.s32.totalorder %s70_s27, %s959_s2  ;;  %p965_p9 = scmp.lt.s32.totalorder %s959_s2, %s959_s2 }
  0x51   :  { %p966_p10 = por %p965_p9, %p964_p8 }
  0x53   :  { %p967_p11 = pnand %p966_p10, %p960_p7 }
  0x55   :  { %970 = shalt.err (!%p967_p11)
}
  0x56   :  { %75 = dma.hbm_to_vmem [thread:$0]  %s1206_s4, 256, %s70_s27, [#allocation9], %s1027_s9, %s1027_s9, %s1028_s10  }
  0x57   :  { %s971_s17 = scalar_lea.hbm %s1207_s5, 512 }
  0x58   :  { %p972_p12 = scmp.ne.s32.totalorder %s1207_s5, %s971_s17  ;;  %p975_p13 = scmp.lt.u32.totalorder %s971_s17, %s1207_s5 }
  0x5a   :  { %p977_p0 = pnand %p975_p13, %p972_p12 }
  0x5c   :  { %980 = shalt.err (!%p977_p0)
}
  0x5d   :  { %s981_s23 = scalar_lea.vmem %s1146_s30, 512  ;;  %p986_p2 = scmp.lt.s32.totalorder %s1146_s30, %s1146_s30 }
  0x5e   :  { %p982_p1 = scmp.ne.s32.totalorder %s1146_s30, %s981_s23  ;;  %p987_p3 = scmp.lt.s32.totalorder %s981_s23, %s981_s23 }
  0x60   :  { %p988_p4 = por %p987_p3, %p986_p2 }
  0x62   :  { %p989_p5 = pnand %p988_p4, %p982_p1 }
  0x64   :  { %992 = shalt.err (!%p989_p5)
}
  0x65   :  { %87 = dma.hbm_to_vmem [thread:$0]  %s1207_s5, 512, %s1146_s30, [#allocation12], %s1029_s1, %s1029_s1, %s1030_s21  }
  0x66   :  { %1015 = dma.done.wait [#allocation3], 1024  }
  0x67   :  { %1016 = vsyncadd [#allocation3], 4294966272 }
  0x68   :  { %1017 = dma.done.wait [#allocation6], 384  }
  0x69   :  { %1018 = vsyncadd [#allocation6], 4294966912 }
  0x6a   :  { %1019 = dma.done.wait [#allocation9], 512  }
  0x6b   :  { %1020 = vsyncadd [#allocation9], 4294966784 }
  0x6c   :  { %1021 = dma.done.wait [#allocation12], 512  }
  0x6d   :  { %1022 = vsyncadd [#allocation12], 4294966784  ;;  %v599_v0 = vld [vmem:[#allocation5] sm:$0xff]   ;;  %v625_v1 = vld [vmem:[#allocation5 + $0x8] sm:$0xff]   ;;  %vm158_vm0 = vcmask 261120   ;;  %v1035_v14 = vmov 0  }
  0x6e   :  { %v607_v2 = vld [vmem:[#allocation7] sm:$0xff]   ;;  %772 = vmatprep.subr.bf16.mxu1 %v599_v0  ;;  %v567_v4 = vld [vmem:[#allocation2] sm:$0xff]   ;;  %v618_v6 = vld [vmem:[#allocation2 + $0x8] sm:$0xff]   ;;  %859 = vset.pattern.permute.xlu0 %v1035_v14  ;;  %vm329_vm1 = vcmask 130048   ;;  %s1036_s5 = smov [#allocation13]  }
  0x6f   :  { %v608_v3 = vunpack.c.l.bf16 %v607_v2  ;;  %774 = vmatpush3.bf16.msra.mxu1 %v599_v0  ;;  %v609_v5 = vunpack.c.h.bf16 %v607_v2  ;;  %v619_v7 = vld [vmem:[#allocation2 + $0x10] sm:$0xff]   ;;  %v620_v8 = vld [vmem:[#allocation2 + $0x18] sm:$0xff]   ;;  %v621_v9 = vld [vmem:[#allocation2 + $0x20] sm:$0xff]   ;;  %860 = vset.pattern.permute.xlu1 %v1035_v14  ;;  %s545_s10 = sshll.u32 %s1036_s5, 4  ;;  %s546_s10 = int_to_ptr.vmem [resolvable:$true] %s545_s10 }
  0x70   :  { %776 = vmatprep.subr.bf16.mxu1 %v625_v1  ;;  %v622_v10 = vld [vmem:[#allocation2 + $0x28] sm:$0xff]   ;;  %v623_v11 = vld [vmem:[#allocation2 + $0x30] sm:$0xff]   ;;  %v624_v12 = vld [vmem:[#allocation2 + $0x38] sm:$0xff]   ;;  %s993_s0 = scalar_lea.vmem %s546_s10, 512  ;;  %p998_p7 = scmp.lt.s32.totalorder %s546_s10, %s546_s10 }
  0x71   :  { %685 = vmatprep.mubr.msk.f32.mxu1 %vm158_vm0, %v608_v3  ;;  %v240_v13 = vld [vmem:[#allocation8] sm:$0xff]  ;;  %v241_v15 = vld [vmem:[#allocation8 + $0x8] sm:$0xff]  ;;  %v429_v16 = vld [vmem:[#allocation11 + $0x10] sm:$0xff]  ;;  %p994_p6 = scmp.ne.s32.totalorder %s546_s10, %s993_s0  ;;  %p999_p8 = scmp.lt.s32.totalorder %s993_s0, %s993_s0 }
  0x72   :  { %244 = vperm.xlu0 %859, %v240_v13   ;;  %v611_v19 = vld [vmem:[#allocation10] sm:$0xff]   ;;  %v626_v30 = vld [vmem:[#allocation10 + $0x8] sm:$0xff]   ;;  %v427_v34 = vld [vmem:[#allocation11] sm:$0xff] }
  0x73   :  { %778 = vmatpush3.bf16.msra.mxu1 %v625_v1  ;;  %v612_v20 = vunpack.c.l.bf16 %v611_v19  ;;  %v613_v31 = vunpack.c.h.bf16 %v611_v19  ;;  %v616_v32 = vunpack.c.l.bf16 %v626_v30  ;;  %v617_v33 = vunpack.c.h.bf16 %v626_v30  ;;  %433 = vperm.xlu1 %860, %v427_v34   ;;  %v428_v35 = vld [vmem:[#allocation11 + $0x8] sm:$0xff]  ;;  %v430_v36 = vld [vmem:[#allocation11 + $0x18] sm:$0xff]  ;;  %p1000_p9 = por %p999_p8, %p998_p7 }
  0x74   :  { %780 = vmatprep.subr.bf16.mxu1 %v567_v4 }
  0x75   :  { %727 = vmatprep.mubr.msk.f32.mxu0 %vm329_vm1, %v612_v20  ;;  %p1001_p10 = pnand %p1000_p9, %p994_p6 }
  0x76   :  { %686 = vmatmul.mubr.msk.f32.vlgmr.msra.gmra.mrb[0].mxu1 %vm158_vm0, %v609_v5  ;;  %249 = vperm.xlu0 %859, %v241_v15  }
  0x77   :  { %782 = vmatpush3.bf16.msra.mxu1 %v567_v4  ;;  %438 = vperm.xlu1 %860, %v428_v35  }
  0x78   :  { %784 = vmatprep.subr.bf16.mxu1 %v618_v6 }
  0x7a   :  { %443 = vperm.xlu0 %859, %v429_v16  }
  0x7b   :  { %786 = vmatpush3.bf16.msra.mxu1 %v618_v6  ;;  %448 = vperm.xlu1 %860, %v430_v36  }
  0x7c   :  { %788 = vmatprep.subr.bf16.mxu1 %v619_v7 }
  0x7f   :  { %790 = vmatpush3.bf16.msra.mxu1 %v619_v7 }
  0x80   :  { %792 = vmatprep.subr.bf16.mxu1 %v620_v8 }
  0x83   :  { %794 = vmatpush3.bf16.msra.mxu1 %v620_v8 }
  0x84   :  { %796 = vmatprep.subr.bf16.mxu1 %v621_v9 }
  0x87   :  { %798 = vmatpush3.bf16.msra.mxu1 %v621_v9 }
  0x88   :  { %800 = vmatprep.subr.bf16.mxu1 %v622_v10 }
  0x8b   :  { %802 = vmatpush3.bf16.msra.mxu1 %v622_v10 }
  0x8c   :  { %804 = vmatprep.subr.bf16.mxu1 %v623_v11 }
  0x8f   :  { %806 = vmatpush3.bf16.msra.mxu1 %v623_v11 }
  0x90   :  { %808 = vmatprep.subr.bf16.mxu1 %v624_v12 }
  0x93   :  { %810 = vmatpush3.bf16.msra.mxu1 %v624_v12 }
  0xf1   :  { %v245_v21 = vpop.permute.xlu0 %244 }
  0xf2   :  { %v434_v41 = vpop.permute.xlu1 %433 }
  0xf5   :  { %v250_v22 = vpop.permute.xlu0 %249 }
  0xf6   :  { %v439_v42 = vpop.permute.xlu1 %438 }
  0xf9   :  { %v444_v49 = vpop.permute.xlu0 %443 }
  0xfa   :  { %v449_v47 = vpop.permute.xlu1 %448 }
 0x149   :  { %v687_v17 = vpop.f32.mrb[0].mxu1 }
 0x14a   :  { %v231_v18 = vpop.f32.mrb[1].mxu1 }
 0x14b   :  { %720 = vmatprep.mubr.f32.mxu1 %v231_v18 }
 0x14c   :  { %721 = vmatmul.mubr.f32.vlgmr.msra.gmra.mrb[2].mxu1 %v687_v17 }
 0x21f   :  { %v722_v23 = vpop.f32.mrb[2].mxu1 }
 0x220   :  { %v324_v24 = vadd.f32 %v722_v23, %v250_v22  ;;  %v318_v25 = vpop.f32.mrb[3].mxu1 }
 0x221   :  { %v319_v26 = vadd.f32 %v318_v25, %v245_v21 }
 0x222   :  { %v328_v27 = vmax.f32 %v324_v24, 0.0 }
 0x223   :  { %v327_v28 = vmax.f32 %v319_v26, 0.0 }
 0x225   :  { %v811_v29 = vpack.c.bf16 %v328_v27, %v327_v28 }
 0x227   :  { %812 = vmatprep.subr.bf16.mxu0 %v811_v29 }
 0x228   :  { %814 = vmatpush3.bf16.msra.mxu0 %v811_v29 }
 0x229   :  { %816 = vmatprep.subr.bf16.mxu0 %v567_v4 }
 0x22b   :  { %728 = vmatmul.mubr.msk.f32.vlgmr.msra.gmra.mrb[0].mxu0 %vm329_vm1, %v613_v31 }
 0x22c   :  { %730 = vmatprep.mubr.msk.f32.mxu0 %vm329_vm1, %v616_v32  ;;  %818 = vmatpush3.bf16.msra.mxu0 %v567_v4 }
 0x22d   :  { %820 = vmatprep.subr.bf16.mxu0 %v618_v6 }
 0x22f   :  { %731 = vmatmul.mubr.msk.f32.gmra.mrb[2].mxu0 %vm329_vm1, %v617_v33 }
 0x230   :  { %822 = vmatpush3.bf16.msra.mxu0 %v618_v6 }
 0x231   :  { %824 = vmatprep.subr.bf16.mxu0 %v619_v7 }
 0x234   :  { %826 = vmatpush3.bf16.msra.mxu0 %v619_v7 }
 0x235   :  { %828 = vmatprep.subr.bf16.mxu0 %v620_v8 }
 0x238   :  { %830 = vmatpush3.bf16.msra.mxu0 %v620_v8 }
 0x239   :  { %832 = vmatprep.subr.bf16.mxu0 %v621_v9 }
 0x23c   :  { %834 = vmatpush3.bf16.msra.mxu0 %v621_v9 }
 0x23d   :  { %836 = vmatprep.subr.bf16.mxu0 %v622_v10 }
 0x240   :  { %838 = vmatpush3.bf16.msra.mxu0 %v622_v10 }
 0x241   :  { %840 = vmatprep.subr.bf16.mxu0 %v623_v11 }
 0x244   :  { %842 = vmatpush3.bf16.msra.mxu0 %v623_v11 }
 0x245   :  { %844 = vmatprep.subr.bf16.mxu0 %v624_v12 }
 0x248   :  { %846 = vmatpush3.bf16.msra.mxu0 %v624_v12 }
 0x2fe   :  { %v729_v37 = vpop.f32.mrb[0].mxu0 }
 0x2ff   :  { %v408_v38 = vpop.f32.mrb[1].mxu0 }
 0x300   :  { %765 = vmatprep.mubr.f32.mxu0 %v408_v38 }
 0x301   :  { %766 = vmatmul.mubr.f32.vlgmr.msra.gmra.mrb[4].mxu0 %v729_v37 }
 0x302   :  { %v732_v39 = vpop.f32.mrb[2].mxu0 }
 0x303   :  { %v418_v40 = vpop.f32.mrb[3].mxu0 }
 0x304   :  { %768 = vmatprep.mubr.f32.mxu0 %v418_v40 }
 0x305   :  { %769 = vmatmul.mubr.f32.gmra.mrb[6].mxu0 %v732_v39 }
 0x3d4   :  { %v767_v43 = vpop.f32.mrb[4].mxu0 }
 0x3d5   :  { %v523_v44 = vadd.f32 %v767_v43, %v439_v42  ;;  %v517_v45 = vpop.f32.mrb[5].mxu0 }
 0x3d6   :  { %v518_v46 = vadd.f32 %v517_v45, %v434_v41 }
 0x3d7   :  { %537 = vst [vmem:[#allocation13 + $0x8] sm:$0xff] %v523_v44 }
 0x3d8   :  { %536 = vst [vmem:[#allocation13] sm:$0xff] %v518_v46  ;;  %v770_v48 = vpop.f32.mrb[6].mxu0 }
 0x3d9   :  { %v533_v50 = vadd.f32 %v770_v48, %v449_v47  ;;  %v527_v51 = vpop.f32.mrb[7].mxu0 }
 0x3da   :  { %v528_v52 = vadd.f32 %v527_v51, %v444_v49 }
 0x3db   :  { %539 = vst [vmem:[#allocation13 + $0x18] sm:$0xff] %v533_v50 }
 0x3dc   :  { %538 = vst [vmem:[#allocation13 + $0x10] sm:$0xff] %v528_v52 }
 0x3dd   :  { %1004 = shalt.err (!%p1001_p10)
}
 0x3de   :  { %s1005_s27 = scalar_lea.hbm %s1208_s6, 512 }
 0x3df   :  { %p1006_p11 = scmp.ne.s32.totalorder %s1208_s6, %s1005_s27  ;;  %p1009_p12 = scmp.lt.u32.totalorder %s1005_s27, %s1208_s6 }
 0x3e1   :  { %p1011_p13 = pnand %p1009_p12, %p1006_p11 }
 0x3e3   :  { %1014 = shalt.err (!%p1011_p13)
}
 0x3e4   :  { %551 = dma.vmem_to_hbm [thread:$0]  %s546_s10, 512, %s1208_s6, [#allocation4], %s1029_s1, %s1029_s1, %s1030_s21  }
 0x3e5   :  { %1023 = dma.done.wait [#allocation4], 512  }
 0x3e6   :  { %1024 = vsyncadd [#allocation4], 4294966784 }
 0x3e7   :  { %555 = vsyncpa [#allocation3], 1 }
 0x3e8   :  { %556 = vsyncpa [#allocation6], 1 }
 0x3e9   :  { %557 = vsyncpa [#allocation9], 1 }
 0x3ea   :  { %558 = vsyncpa [#allocation12], 1 }
 0x3eb   :  { %559 = vsyncpa [#allocation4], 1 }

</bundles_post_ra>
